<compile_context>
chip_gen: v6e
topology: v6e:2x2x1
jax: 0.10.0
libtpu: 0.0.40
codegen_flags: <defaults>
</compile_context>

<pallas_src>
import math

import jax
import jax.numpy as jnp
from jax.experimental import pallas as pl
from jax.experimental.pallas import tpu as pltpu

LANE = 128
# (1024, 128) f32 = 512 KiB per block; 3 arrays x 2 buffers ~= 3 MiB VMEM,
# comfortably inside the default scoped VMEM on v5e (16 MiB) / v6e / v7x.
TARGET_TILE_ROWS = 1024


def _laplacian_nll0d_kernel(aux_weight):
    # aux_weight is baked in as a compile-time constant; a distinct value
    # triggers a retrace (fine for a fixed loss hyperparameter).
    log2 = math.log(2.0)

    def kernel(x_ref, s_ref, o_ref):
        # Upcast to f32 for the math (v5e VPU/EUP have no bf16 path); only the
        # HBM format follows the caller's dtype.
        x = x_ref[...].astype(jnp.float32)
        s = s_ref[...].astype(jnp.float32)
        # |x| * exp(-s)  -> VPU (abs/mul) + EUP (exp); neither saturates at the
        # HBM roofline, so no further in-kernel micro-opts are worthwhile.
        o = jnp.abs(x) * jnp.exp(-s) + aux_weight * (s + log2)
        o_ref[...] = o.astype(o_ref.dtype)

    return kernel


def laplacian_nll0d_v2(x, scale, aux_weight=1.0, scale_lb=1e-4, scale_init=0.5413):
    """Pallas implementation of LaplacianNLL0Dv2.forward.

    x:     [b, num_recs, h, w]
    scale: [b, num_recs, 1, h, w]   (dim 2 is squeezed, as in torch)
    returns: same shape as x, dtype = promoted input dtype.
    """
    # scale_lb / scale_init are construction-time hyperparameters that do not
    # enter the forward math in the reference module; kept for signature parity.
    del scale_lb, scale_init

    assert x.shape[0] == scale.shape[0] and x.shape[1] == scale.shape[1]

    s = jnp.squeeze(scale, axis=2)

    # HBM I/O dtype: keep the caller's precision (bf16 stays bf16 -> half the
    # bytes moved); math is f32 inside the kernel.
    io_dtype = jnp.promote_types(x.dtype, s.dtype)
    if x.dtype != io_dtype:
        x = x.astype(io_dtype)
    if s.dtype != io_dtype:
        s = s.astype(io_dtype)
    if s.shape != x.shape:
        # Only materialize a broadcast if the squeezed scale really differs.
        s = jnp.broadcast_to(s, x.shape)

    orig_shape = x.shape
    total = x.size

    xf = x.reshape(-1)
    sf = s.reshape(-1)

    # Fast path: no padding when the element count is already a whole number
    # of 128-lane rows. Slow path pads only to the next multiple of 128.
    pad = (-total) % LANE
    if pad:
        xf = jnp.pad(xf, (0, pad))
        sf = jnp.pad(sf, (0, pad))
    rows = (total + pad) // LANE

    x2 = xf.reshape(rows, LANE)
    s2 = sf.reshape(rows, LANE)

    # Big tiles for this memory-bound op. If the array is smaller than the
    # target tile, use the full array as a single block (block == full dims is
    # always legal); otherwise use a (8,128)-aligned 1024-row block and let
    # Pallas mask the partial last block.
    tile_rows = rows if rows <= TARGET_TILE_ROWS else TARGET_TILE_ROWS
    grid = (pl.cdiv(rows, tile_rows),)
    block = pl.BlockSpec((tile_rows, LANE), lambda i: (i, 0))

    out2 = pl.pallas_call(
        _laplacian_nll0d_kernel(float(aux_weight)),
        out_shape=jax.ShapeDtypeStruct((rows, LANE), io_dtype),
        grid_spec=pltpu.PrefetchScalarGridSpec(
            num_scalar_prefetch=0,
            grid=grid,
            in_specs=[block, block],
            out_specs=block,
        ),
        compiler_params=pltpu.CompilerParams(
            dimension_semantics=("parallel",),
        ),
    )(x2, s2)

    out = out2.reshape(-1)
    if pad:
        out = out[:total]
    return out.reshape(orig_shape)


def _reference(x, scale, aux_weight=1.0):
    s = jnp.squeeze(scale, axis=2)
    x32 = x.astype(jnp.float32)
    s32 = s.astype(jnp.float32)
    return jnp.abs(x32) * jnp.exp(-s32) + aux_weight * (s32 + math.log(2.0))


if __name__ == "__main__":
    key = jax.random.PRNGKey(0)
    kx, ks, kx2, ks2 = jax.random.split(key, 4)

    # Main check: shapes implied by the module, f32, total % 128 == 0 -> no-pad
    # fast path.
    b, num_recs, h, w = 2, 4, 16, 16
    x = jax.random.normal(kx, (b, num_recs, h, w), dtype=jnp.float32)
    scale = 0.5413 + 0.1 * jax.random.normal(
        ks, (b, num_recs, 1, h, w), dtype=jnp.float32
    )
    out = jax.block_until_ready(laplacian_nll0d_v2(x, scale, aux_weight=1.0))
    ref = _reference(x, scale, aux_weight=1.0)
    assert out.shape == x.shape and out.dtype == jnp.float32
    assert jnp.allclose(out, ref, atol=1e-5, rtol=1e-5), "mismatch vs reference (f32)"

    # Secondary check: odd element count exercises the pad/slice slow path and
    # aux_weight != 1.
    xb = jax.random.normal(kx2, (2, 3, 5, 7), dtype=jnp.float32)
    sb = 0.5413 + 0.1 * jax.random.normal(ks2, (2, 3, 1, 5, 7), dtype=jnp.float32)
    outb = jax.block_until_ready(laplacian_nll0d_v2(xb, sb, aux_weight=0.5))
    refb = _reference(xb, sb, aux_weight=0.5)
    assert outb.shape == xb.shape
    assert jnp.allclose(outb, refb, atol=1e-5, rtol=1e-5), "mismatch vs reference (odd)"

    print("KERNEL_OK")
</pallas_src>

<mosaic_0001>
module attributes {stable_mosaic.version = 11 : i64} {
  func.func @kernel(%arg0: i32, %arg1: memref<16x128xf32, #tpu.memory_space<vmem>>, %arg2: memref<16x128xf32, #tpu.memory_space<vmem>>, %arg3: memref<16x128xf32, #tpu.memory_space<vmem>>) attributes {dimension_semantics = [#tpu.dimension_semantics<parallel>], iteration_bounds = array<i64: 1>, scalar_prefetch = 0 : i64, scratch_operands = 0 : i64, tpu.core_type = #tpu.core_type<tc>, window_params = [{transform_indices = @transform_0, window_bounds = array<i64: 16, 128>}, {transform_indices = @transform_1, window_bounds = array<i64: 16, 128>}, {transform_indices = @transform_2, window_bounds = array<i64: 16, 128>}]} {
    %c0 = arith.constant 0 : index
    %c0_0 = arith.constant 0 : index
    %0 = vector.load %arg1[%c0, %c0_0] : memref<16x128xf32, #tpu.memory_space<vmem>>, vector<16x128xf32>
    %c0_1 = arith.constant 0 : index
    %c0_2 = arith.constant 0 : index
    %1 = vector.load %arg2[%c0_1, %c0_2] : memref<16x128xf32, #tpu.memory_space<vmem>>, vector<16x128xf32>
    %2 = math.absf %0 : vector<16x128xf32>
    %cst = arith.constant 0.000000e+00 : f32
    %3 = vector.broadcast %cst : f32 to vector<16x128xf32>
    %4 = arith.subf %3, %1 : vector<16x128xf32>
    %5 = math.exp %4 : vector<16x128xf32>
    %6 = arith.mulf %2, %5 : vector<16x128xf32>
    %cst_3 = arith.constant 0.693147182 : f32
    %7 = vector.broadcast %cst_3 : f32 to vector<16x128xf32>
    %8 = arith.addf %1, %7 : vector<16x128xf32>
    %cst_4 = arith.constant 1.000000e+00 : f32
    %9 = vector.broadcast %cst_4 : f32 to vector<16x128xf32>
    %10 = arith.mulf %9, %8 : vector<16x128xf32>
    %11 = arith.addf %6, %10 : vector<16x128xf32>
    %c0_5 = arith.constant 0 : index
    %c0_6 = arith.constant 0 : index
    %12 = vector.load %arg3[%c0_5, %c0_6] : memref<16x128xf32, #tpu.memory_space<vmem>>, vector<16x128xf32>
    tpu.vector_store %arg3[%c0_5, %c0_6], %11 {strides = array<i32>} : memref<16x128xf32, #tpu.memory_space<vmem>>, vector<16x128xf32>,
    return
  }
  func.func @transform_0(%arg0: i32) -> (i32, i32) {
    %c0_i32 = arith.constant 0 : i32
    %c0_i32_0 = arith.constant 0 : i32
    return %arg0, %c0_i32 : i32, i32
  }
  func.func @transform_1(%arg0: i32) -> (i32, i32) {
    %c0_i32 = arith.constant 0 : i32
    %c0_i32_0 = arith.constant 0 : i32
    return %arg0, %c0_i32 : i32, i32
  }
  func.func @transform_2(%arg0: i32) -> (i32, i32) {
    %c0_i32 = arith.constant 0 : i32
    %c0_i32_0 = arith.constant 0 : i32
    return %arg0, %c0_i32 : i32, i32
  }
}

</mosaic_0001>

<bundles_post_ra>
// kernel: tpu_custom_call.1
= control target key start
LH: loop header
LB: loop body
LE: loop exit
PB: predicated region body
PF: predicated region fallthrough
CT: control target
= control target key end

     0   :  { %7 = vsyncpa [#allocation3], 0  ;;  %s191_s0 = inlined_call_operand.hbm [shape: f32[16,128], index: 0, kind: input, shape index: {}]   ;;  %s192_s1 = inlined_call_operand.hbm [shape: f32[16,128], index: 1, kind: input, shape index: {}]   ;;  %s193_s2 = inlined_call_operand.hbm [shape: f32[16,128], index: 2, kind: output, shape index: {}]  }
   0x1   :  { %8 = vsyncpa [#allocation6], 0 }
   0x2   :  { %9 = vsyncpa [#allocation4], 0  ;;  %s153_s9 = smov [#allocation2]  }
   0x3   :  { %s15_s10 = sshll.u32 %s153_s9, 4  ;;  %s16_s10 = int_to_ptr.vmem [resolvable:$true] %s15_s10 }
   0x4   :  { %s95_s11 = scalar_lea.vmem %s16_s10, 256  ;;  %p100_p1 = scmp.lt.s32.totalorder %s16_s10, %s16_s10 }
   0x5   :  { %p96_p0 = scmp.ne.s32.totalorder %s16_s10, %s95_s11  ;;  %p101_p2 = scmp.lt.s32.totalorder %s95_s11, %s95_s11 }
   0x7   :  { %p102_p3 = por %p101_p2, %p100_p1 }
   0x9   :  { %p103_p4 = pnand %p102_p3, %p96_p0 }
   0xb   :  { %106 = shalt.err (!%p103_p4)
}
   0xc   :  { %s154_s12 = smov 128   ;;  %s155_s13 = smov 8  }
   0xd   :  { %21 = dma.hbm_to_vmem [thread:$0]  %s191_s0, 256, %s16_s10, [#allocation3], %s154_s12, %s154_s12, %s155_s13  }
   0xe   :  { %s156_s16 = smov [#allocation5]  }
   0xf   :  { %s27_s17 = sshll.u32 %s156_s16, 4  ;;  %s28_s17 = int_to_ptr.vmem [resolvable:$true] %s27_s17 }
  0x10   :  { %s115_s18 = scalar_lea.vmem %s28_s17, 256  ;;  %p120_p6 = scmp.lt.s32.totalorder %s28_s17, %s28_s17 }
  0x11   :  { %p116_p5 = scmp.ne.s32.totalorder %s28_s17, %s115_s18  ;;  %p121_p7 = scmp.lt.s32.totalorder %s115_s18, %s115_s18 }
  0x13   :  { %p122_p8 = por %p121_p7, %p120_p6 }
  0x15   :  { %p123_p9 = pnand %p122_p8, %p116_p5 }
  0x17   :  { %126 = shalt.err (!%p123_p9)
}
  0x18   :  { %33 = dma.hbm_to_vmem [thread:$0]  %s192_s1, 256, %s28_s17, [#allocation6], %s154_s12, %s154_s12, %s155_s13  }
  0x19   :  { %147 = dma.done.wait [#allocation3], 256  }
  0x1a   :  { %148 = vsyncadd [#allocation3], 4294967040 }
  0x1b   :  { %149 = dma.done.wait [#allocation6], 256  }
  0x1c   :  { %150 = vsyncadd [#allocation6], 4294967040  ;;  %v42_v0 = vld [vmem:[#allocation5] sm:$0xff]  ;;  %v43_v2 = vld [vmem:[#allocation5 + $0x8] sm:$0xff]  ;;  %s157_s0 = smov [#allocation7]  }
  0x1d   :  { %v46_v1 = vsub.f32 0.0, %v42_v0  ;;  %v47_v3 = vsub.f32 0.0, %v43_v2  ;;  %v40_v6 = vld [vmem:[#allocation2] sm:$0xff]  ;;  %v41_v7 = vld [vmem:[#allocation2 + $0x8] sm:$0xff]  ;;  %v54_v10 = vadd.f32 0.6931472, %v42_v0 }
  0x1e   :  { %v44_v8 = vand.u32 2147483647, %v40_v6  ;;  %v45_v9 = vand.u32 2147483647, %v41_v7  ;;  %v55_v12 = vadd.f32 0.6931472, %v43_v2 }
  0x1f   :  { %v48_v4 = vmul.f32 1.442695, %v46_v1  ;;  %v50_v5 = vmul.f32 1.442695, %v47_v3  ;;  %s65_s1 = sshll.u32 %s157_s0, 4  ;;  %s66_s1 = int_to_ptr.vmem [resolvable:$true] %s65_s1 }
  0x20   :  { %s127_s21 = scalar_lea.vmem %s66_s1, 256  ;;  %p132_p11 = scmp.lt.s32.totalorder %s66_s1, %s66_s1 }
  0x21   :  { %83 = vpow2.f32 %v48_v4  ;;  %p128_p10 = scmp.ne.s32.totalorder %s66_s1, %s127_s21  ;;  %p133_p12 = scmp.lt.s32.totalorder %s127_s21, %s127_s21 }
  0x22   :  { %85 = vpow2.f32 %v50_v5 }
  0x23   :  { %p134_p13 = por %p133_p12, %p132_p11 }
  0x25   :  { %p135_p0 = pnand %p134_p13, %p128_p10 }
  0x2e   :  { %v84_v11 = vpop.eup %83 }
  0x2f   :  { %v86_v13 = vpop.eup %85  ;;  %v52_v14 = vmul.f32 %v84_v11, %v44_v8 }
  0x30   :  { %v53_v15 = vmul.f32 %v86_v13, %v45_v9 }
  0x31   :  { %v56_v16 = vadd.f32 %v54_v10, %v52_v14 }
  0x32   :  { %v57_v17 = vadd.f32 %v55_v12, %v53_v15 }
  0x33   :  { %58 = vst [vmem:[#allocation7] sm:$0xff] %v56_v16 }
  0x34   :  { %59 = vst [vmem:[#allocation7 + $0x8] sm:$0xff] %v57_v17 }
  0x35   :  { %138 = shalt.err (!%p135_p0)
}
  0x36   :  { %71 = dma.vmem_to_hbm [thread:$0]  %s66_s1, 256, %s193_s2, [#allocation4], %s154_s12, %s154_s12, %s155_s13  }
  0x37   :  { %151 = dma.done.wait [#allocation4], 256  }
  0x38   :  { %152 = vsyncadd [#allocation4], 4294967040 }
  0x39   :  { %75 = vsyncpa [#allocation3], 1 }
  0x3a   :  { %76 = vsyncpa [#allocation6], 1 }
  0x3b   :  { %77 = vsyncpa [#allocation4], 1 }

</bundles_post_ra>
